<compile_context>
chip_gen: v6e
topology: v6e:2x2x1
jax: 0.10.0
libtpu: 0.0.40
codegen_flags: <defaults>
</compile_context>

<pallas_src>
import functools

import jax
import jax.numpy as jnp
from jax.experimental import pallas as pl
from jax.experimental.pallas import tpu as pltpu

LANE = 128
MAX_BLOCK_ROWS = 8192   # (8192, 128) f32 block = 4 MiB; x2 buffers = 8 MiB VMEM
NCORES = 2              # TensorCore split (helps v7x); harmless on 1-TC chips


def _ofloss_kernel(x_ref, out_ref, acc_ref, *, rows, block_rows, num_blocks,
                   steps_per_core):
    p = pl.program_id(0)   # parallel (core) axis
    s = pl.program_id(1)   # sequential scan over this core's row blocks
    blk = p * steps_per_core + s

    @pl.when(s == 0)
    def _():
        acc_ref[...] = jnp.zeros_like(acc_ref)

    ragged = (rows % block_rows) != 0   # static: does any block need a mask?

    @pl.when(blk < num_blocks)          # skip duplicated blocks from core split
    def _():
        x = x_ref[...].astype(jnp.float32)
        if ragged:
            # Mask rows past the end of the (padded) array: the boundary block
            # may contain garbage from the clamped DMA.  Masked rows give 0 and
            # log(0 + 1) == 0, so they do not affect the sum.
            row_ids = blk * block_rows + jax.lax.broadcasted_iota(
                jnp.int32, (block_rows, LANE), 0)
            x = jnp.where(row_ids < rows, x, 0.0)

        # |x - clamp(x, 0, 1)| == relu(x - 1) + relu(-x)
        over = jnp.maximum(x - 1.0, 0.0) + jnp.maximum(-x, 0.0)
        v = jnp.log(over + 1.0)                       # EUP

        # Pure-VPU partial reduce: fold the tile's sublane groups into (8, LANE).
        acc_ref[...] += v.reshape(-1, 8, LANE).sum(axis=0)

    @pl.when(s == steps_per_core - 1)
    def _():
        out_ref[0, 0] = jnp.sum(acc_ref[...])         # one cross-lane reduce/core


def of_loss(img):
    """img: (b, c, h, w) array. Returns scalar f32 overflow loss."""
    b, c, h, w = img.shape
    n = b * c * h * w

    flat = img.reshape(-1)                      # free; keep native dtype
    rem = (-n) % LANE
    if rem:                                     # tiny pad only if n % 128 != 0
        flat = jnp.pad(flat, (0, rem))          # zeros contribute log(1) = 0
    rows = flat.shape[0] // LANE
    x2d = flat.reshape(rows, LANE)

    block_rows = min(MAX_BLOCK_ROWS, ((rows + 7) // 8) * 8)
    num_blocks = -(-rows // block_rows)
    ncores = NCORES if num_blocks >= NCORES else 1
    steps_per_core = -(-num_blocks // ncores)

    kernel = functools.partial(
        _ofloss_kernel, rows=rows, block_rows=block_rows,
        num_blocks=num_blocks, steps_per_core=steps_per_core)

    def x_index(p, s):
        # Clamp so the DMA never walks past the last block; duplicated blocks
        # are skipped inside the kernel via pl.when(blk < num_blocks).
        return (jnp.minimum(p * steps_per_core + s, num_blocks - 1), 0)

    partials = pl.pallas_call(
        kernel,
        out_shape=jax.ShapeDtypeStruct((ncores, 1), jnp.float32),
        grid=(ncores, steps_per_core),
        in_specs=[pl.BlockSpec((block_rows, LANE), x_index)],
        out_specs=pl.BlockSpec((1, 1), lambda p, s: (p, 0),
                               memory_space=pltpu.SMEM),
        scratch_shapes=[pltpu.VMEM((8, LANE), jnp.float32)],
        compiler_params=pltpu.CompilerParams(
            dimension_semantics=("parallel", "arbitrary")),
    )(x2d)

    return jnp.sum(partials) / n


def of_loss_ref(img):
    img = img.astype(jnp.float32)
    img_clamp = jnp.clip(img, 0.0, 1.0)
    b, c, h, w = img.shape
    return jnp.sum(jnp.log(jnp.abs(img - img_clamp) + 1.0)) / b / c / h / w


if __name__ == "__main__":
    key = jax.random.PRNGKey(0)

    # Main small test (values outside [0, 1] so the loss is nonzero).
    x = jax.random.normal(key, (2, 4, 16, 16), dtype=jnp.float32) * 1.5
    out = jax.block_until_ready(of_loss(x))
    ref = jax.block_until_ready(of_loss_ref(x))
    assert jnp.allclose(out, ref, rtol=1e-5, atol=1e-6), (out, ref)

    # Ragged shape (element count not a multiple of 128) -> exercises pad path.
    x2 = jax.random.normal(jax.random.PRNGKey(1), (1, 3, 17, 19),
                           dtype=jnp.float32) * 2.0 - 0.5
    out2 = jax.block_until_ready(of_loss(x2))
    ref2 = jax.block_until_ready(of_loss_ref(x2))
    assert jnp.allclose(out2, ref2, rtol=1e-5, atol=1e-6), (out2, ref2)

    # Multi-block ragged shape -> exercises 2-core split + tail-block mask.
    x3 = jax.random.normal(jax.random.PRNGKey(2), (2, 3, 512, 512),
                           dtype=jnp.float32) * 1.5
    out3 = jax.block_until_ready(of_loss(x3))
    ref3 = jax.block_until_ready(of_loss_ref(x3))
    assert jnp.allclose(out3, ref3, rtol=1e-5, atol=1e-5), (out3, ref3)

    # Odd block count -> exercises duplicated-block skip on the core split.
    x4 = jax.random.normal(jax.random.PRNGKey(3), (3, 4, 512, 512),
                           dtype=jnp.float32) * 1.5
    out4 = jax.block_until_ready(of_loss(x4))
    ref4 = jax.block_until_ready(of_loss_ref(x4))
    assert jnp.allclose(out4, ref4, rtol=1e-5, atol=1e-5), (out4, ref4)

    print("KERNEL_OK")
</pallas_src>

<mosaic_0001>
module attributes {stable_mosaic.version = 11 : i64} {
  func.func @_ofloss_kernel(%arg0: i32, %arg1: i32, %arg2: memref<16x128xf32, #tpu.memory_space<vmem>>, %arg3: memref<1x1xf32, #tpu.memory_space<smem>>, %arg4: memref<8x128xf32, #tpu.memory_space<vmem>>) attributes {dimension_semantics = [#tpu.dimension_semantics<parallel>, #tpu.dimension_semantics<arbitrary>], iteration_bounds = array<i64: 1, 1>, scalar_prefetch = 0 : i64, scratch_operands = 1 : i64, tpu.core_type = #tpu.core_type<tc>, window_params = [{transform_indices = @transform_0, window_bounds = array<i64: 16, 128>}, {transform_indices = @transform_1, window_bounds = array<i64: 1, 1>}]} {
    %c1_i32 = arith.constant 1 : i32
    %0 = arith.muli %arg0, %c1_i32 : i32
    %1 = arith.addi %0, %arg1 : i32
    %c0_i32 = arith.constant 0 : i32
    %2 = arith.cmpi eq, %arg1, %c0_i32 : i32
    %3 = arith.extui %2 : i1 to i32
    %c0_i32_0 = arith.constant 0 : i32
    %4 = arith.cmpi ne, %3, %c0_i32_0 : i32
    scf.if %4 {
      %cst = arith.constant 0.000000e+00 : f32
      %11 = vector.broadcast %cst : f32 to vector<8x128xf32>
      %c0 = arith.constant 0 : index
      %c0_5 = arith.constant 0 : index
      %12 = vector.load %arg4[%c0, %c0_5] : memref<8x128xf32, #tpu.memory_space<vmem>>, vector<8x128xf32>
      tpu.vector_store %arg4[%c0, %c0_5], %11 {strides = array<i32>} : memref<8x128xf32, #tpu.memory_space<vmem>>, vector<8x128xf32>,
    } else {
    }
    %c1_i32_1 = arith.constant 1 : i32
    %5 = arith.cmpi slt, %1, %c1_i32_1 : i32
    %6 = arith.extui %5 : i1 to i32
    %c0_i32_2 = arith.constant 0 : i32
    %7 = arith.cmpi ne, %6, %c0_i32_2 : i32
    scf.if %7 {
      %c0 = arith.constant 0 : index
      %c0_5 = arith.constant 0 : index
      %11 = vector.load %arg2[%c0, %c0_5] : memref<16x128xf32, #tpu.memory_space<vmem>>, vector<16x128xf32>
      %cst = arith.constant 1.000000e+00 : f32
      %12 = vector.broadcast %cst : f32 to vector<16x128xf32>
      %13 = arith.subf %11, %12 : vector<16x128xf32>
      %cst_6 = arith.constant 0.000000e+00 : f32
      %14 = vector.broadcast %cst_6 : f32 to vector<16x128xf32>
      %15 = arith.maximumf %13, %14 : vector<16x128xf32>
      %cst_7 = arith.constant 0.000000e+00 : f32
      %16 = vector.broadcast %cst_7 : f32 to vector<16x128xf32>
      %17 = arith.subf %16, %11 : vector<16x128xf32>
      %cst_8 = arith.constant 0.000000e+00 : f32
      %18 = vector.broadcast %cst_8 : f32 to vector<16x128xf32>
      %19 = arith.maximumf %17, %18 : vector<16x128xf32>
      %20 = arith.addf %15, %19 : vector<16x128xf32>
      %cst_9 = arith.constant 1.000000e+00 : f32
      %21 = vector.broadcast %cst_9 : f32 to vector<16x128xf32>
      %22 = arith.addf %20, %21 : vector<16x128xf32>
      %23 = math.log %22 : vector<16x128xf32>
      %c0_10 = arith.constant 0 : index
      %c0_11 = arith.constant 0 : index
      %24 = vector.load %arg4[%c0_10, %c0_11] : memref<8x128xf32, #tpu.memory_space<vmem>>, vector<8x128xf32>
      %25 = vector.shape_cast %23 : vector<16x128xf32> to vector<2x8x128xf32>
      %cst_12 = arith.constant dense<0.000000e+00> : vector<8x128xf32>
      %26 = vector.multi_reduction <add>, %25, %cst_12 [0] : vector<2x8x128xf32> to vector<8x128xf32>
      %27 = arith.addf %24, %26 : vector<8x128xf32>
      %c0_13 = arith.constant 0 : index
      %c0_14 = arith.constant 0 : index
      %28 = vector.load %arg4[%c0_13, %c0_14] : memref<8x128xf32, #tpu.memory_space<vmem>>, vector<8x128xf32>
      tpu.vector_store %arg4[%c0_13, %c0_14], %27 {strides = array<i32>} : memref<8x128xf32, #tpu.memory_space<vmem>>, vector<8x128xf32>,
    } else {
    }
    %c0_i32_3 = arith.constant 0 : i32
    %8 = arith.cmpi eq, %arg1, %c0_i32_3 : i32
    %9 = arith.extui %8 : i1 to i32
    %c0_i32_4 = arith.constant 0 : i32
    %10 = arith.cmpi ne, %9, %c0_i32_4 : i32
    scf.if %10 {
      %c0 = arith.constant 0 : index
      %c0_5 = arith.constant 0 : index
      %11 = vector.load %arg4[%c0, %c0_5] : memref<8x128xf32, #tpu.memory_space<vmem>>, vector<8x128xf32>
      %12 = vector.shape_cast %11 : vector<8x128xf32> to vector<1x8x128xf32>
      %cst = arith.constant dense<0.000000e+00> : vector<1xf32>
      %13 = vector.multi_reduction <add>, %12, %cst [1, 2] : vector<1x8x128xf32> to vector<1xf32>
      %14 = vector.shape_cast %13 : vector<1xf32> to vector<1x1x1xf32>
      %15 = vector.extract %14[0, 0, 0] : f32 from vector<1x1x1xf32>
      %c0_6 = arith.constant 0 : index
      %c0_7 = arith.constant 0 : index
      %16 = memref.load %arg3[%c0_6, %c0_7] : memref<1x1xf32, #tpu.memory_space<smem>>
      memref.store %15, %arg3[%c0_6, %c0_7] : memref<1x1xf32, #tpu.memory_space<smem>>
    } else {
    }
    return
  }
  func.func @transform_0(%arg0: i32, %arg1: i32) -> (i32, i32) {
    %c1_i32 = arith.constant 1 : i32
    %0 = arith.muli %arg0, %c1_i32 : i32
    %1 = arith.addi %0, %arg1 : i32
    %c0_i32 = arith.constant 0 : i32
    %2 = arith.minsi %1, %c0_i32 : i32
    %c0_i32_0 = arith.constant 0 : i32
    %c0_i32_1 = arith.constant 0 : i32
    return %2, %c0_i32_0 : i32, i32
  }
  func.func @transform_1(%arg0: i32, %arg1: i32) -> (i32, i32) {
    %c0_i32 = arith.constant 0 : i32
    %c0_i32_0 = arith.constant 0 : i32
    return %arg0, %c0_i32 : i32, i32
  }
}

</mosaic_0001>

<bundles_post_ra>
// kernel: tpu_custom_call.1
= control target key start
LH: loop header
LB: loop body
LE: loop exit
PB: predicated region body
PF: predicated region fallthrough
CT: control target
= control target key end

     0   :  { %6 = vsyncpa [#allocation4], 0  ;;  %s160_s0 = inlined_call_operand.hbm [shape: f32[16,128], index: 0, kind: input, shape index: {}]   ;;  %s161_s1 = inlined_call_operand.hbm [shape: f32[1,1], index: 1, kind: output, shape index: {}]  }
   0x1   :  { %7 = vsyncpa [#allocation5], 0  ;;  %s140_s6 = smov [#allocation3]  }
   0x2   :  { %s19_s7 = sshll.u32 %s140_s6, 4  ;;  %s20_s7 = int_to_ptr.vmem [resolvable:$true] %s19_s7 }
   0x3   :  { %s116_s8 = scalar_lea.vmem %s20_s7, 256  ;;  %p121_p1 = scmp.lt.s32.totalorder %s20_s7, %s20_s7 }
   0x4   :  { %p117_p0 = scmp.ne.s32.totalorder %s20_s7, %s116_s8  ;;  %p122_p2 = scmp.lt.s32.totalorder %s116_s8, %s116_s8 }
   0x6   :  { %p123_p3 = por %p122_p2, %p121_p1 }
   0x8   :  { %p124_p4 = pnand %p123_p3, %p117_p0 }
   0xa   :  { %127 = shalt.err (!%p124_p4)
}
   0xb   :  { %s141_s9 = smov 128   ;;  %s142_s10 = smov 8  }
   0xc   :  { %25 = dma.hbm_to_vmem [thread:$0]  %s160_s0, 256, %s20_s7, [#allocation4], %s141_s9, %s141_s9, %s142_s10  }
   0xd   :  { %136 = dma.done.wait [#allocation4], 256  }
   0xe   :  { %137 = vsyncadd [#allocation4], 4294967040  ;;  %v43_v0 = vld [vmem:[#allocation3] sm:$0xff]  ;;  %v44_v1 = vld [vmem:[#allocation3 + $0x8] sm:$0xff]  ;;  %s143_s13 = smov [#allocation6]  }
   0xf   :  { %v96_v2 = vadd.f32 -1.0, %v43_v0  ;;  %v97_v3 = vadd.f32 -1.0, %v44_v1  ;;  %v49_v4 = vsub.f32 0.0, %v43_v0  ;;  %v50_v5 = vsub.f32 0.0, %v44_v1 }
  0x11   :  { %v47_v6 = vmax.f32 %v96_v2, 0.0  ;;  %v48_v7 = vmax.f32 %v97_v3, 0.0  ;;  %v51_v8 = vmax.f32 %v49_v4, 0.0  ;;  %v52_v9 = vmax.f32 %v50_v5, 0.0 }
  0x13   :  { %v53_v10 = vadd.f32 %v51_v8, %v47_v6  ;;  %v54_v11 = vadd.f32 %v52_v9, %v48_v7 }
  0x15   :  { %v55_v12 = vadd.f32 1.0, %v53_v10  ;;  %v56_v13 = vadd.f32 1.0, %v54_v11 }
  0x17   :  { %104 = vlog2.f32 %v55_v12 }
  0x18   :  { %106 = vlog2.f32 %v56_v13 }
  0x24   :  { %v105_v14 = vpop.eup %104 }
  0x25   :  { %v107_v15 = vpop.eup %106  ;;  %v58_v16 = vmul.f32 0.6931472, %v105_v14 }
  0x26   :  { %v60_v17 = vmul.f32 0.6931472, %v107_v15 }
  0x28   :  { %v62_v18 = vadd.f32 %v60_v17, %v58_v16 }
  0x2a   :  { %69 = vadd.xlane.f32.xlu0 %v62_v18 }
  0xb3   :  { %v70_v19 = vpop.xlane.xlu0 %69 }
  0xb4   :  { %v71_v20 = vrot.slane %v70_v19, 4 }
  0xb6   :  { %v72_v21 = vadd.f32 %v71_v20, %v70_v19 }
  0xb8   :  { %v73_v22 = vrot.slane %v72_v21, 2 }
  0xba   :  { %v74_v23 = vadd.f32 %v73_v22, %v72_v21 }
  0xbc   :  { %v75_v24 = vrot.slane %v74_v23, 1 }
  0xbe   :  { %v76_v25 = vadd.f32 %v75_v24, %v74_v23 }
  0xc0   :  { %98 = vpush %v76_v25 }
  0xf1   :  { %s99_s0 = spop %98 }
  0xf2   :  { %79 = sst [smem:[#allocation6]] %s99_s0 }
  0xf3   :  { %87 = dma.smem_to_hbm %s143_s13, 16, %s161_s1, [#allocation5]  }
  0xf4   :  { %138 = dma.done.wait [#allocation5], 16  }
  0xf5   :  { %139 = vsyncadd [#allocation5], 4294967280 }
  0xf6   :  { %91 = sfence }
  0xf7   :  { %92 = vsyncpa [#allocation4], 1 }
  0xf8   :  { %93 = vsyncpa [#allocation5], 1 }

</bundles_post_ra>
